<compile_context>
chip_gen: v7x
topology: tpu7x:2x2x1
jax: 0.10.0
libtpu: 0.0.40
codegen_flags: <defaults>
</compile_context>

<pallas_src>
import functools
import inspect
import math

import jax
import jax.numpy as jnp
from jax import lax
from jax.experimental import pallas as pl
from jax.experimental.pallas import tpu as pltpu

GAMMA = 32.0
MARGIN = 0.25
NEG_BIG = -99999999.0

# Fixed log-sum-exp shifts (valid logits are bounded, masked entries contribute 0).
SHIFT_P = GAMMA                     # 32
SHIFT_N = GAMMA * (1.0 + MARGIN)    # 40
C_P = math.exp(-SHIFT_P)                    # exp(-g*d - SHIFT_P) = C_P / exp(g*d)
C_N = math.exp(GAMMA * MARGIN - SHIFT_N)    # exp(g*(d+m) - SHIFT_N) = C_N * exp(g*d)

ACC_W = 512   # fixed lane width of the in-kernel exp-sum accumulators

# Feature-detect pipeline_mode=pl.Buffered(k) so the script also runs on jax builds
# that predate it (falls back to default double-buffering everywhere).
try:
    _HAS_BUFFERED = (hasattr(pl, "Buffered") and
                     "pipeline_mode" in inspect.signature(pl.BlockSpec).parameters)
except Exception:       # pragma: no cover - defensive
    _HAS_BUFFERED = False


def _spec(shape, index_map, buffers=None):
    if buffers is not None and _HAS_BUFFERED:
        return pl.BlockSpec(shape, index_map, pipeline_mode=pl.Buffered(buffers))
    return pl.BlockSpec(shape, index_map)


def _tpu_hw():
    """(physical VMEM bytes per TensorCore, TensorCores per chip), safe fallbacks."""
    kind = ""
    try:
        kind = jax.devices()[0].device_kind.lower()
    except Exception:
        pass
    is_v7 = "v7" in kind
    vmem_cap = 64 * 2**20 if is_v7 else 128 * 2**20   # v7x: 64 MiB/TC, else 128 MiB
    try:
        cap = int(pltpu.get_tpu_info().vmem_capacity_bytes)
        if cap >= 48 * 2**20:        # ignore scoped-default style answers
            vmem_cap = cap
    except Exception:
        pass
    num_tc = 2 if is_v7 else 1       # v5e / v6e have a single TensorCore per chip
    return vmem_cap, num_tc


def _cosface_kernel(ptr_ref, targets_ref, feat_ref, queue_ref, label_ref,
                    accp_ref, accn_ref, *, approx_recip):
    c = pl.program_id(0)            # K-chunk axis ("parallel": megacore split)
    k = pl.program_id(1)            # reduction axis within the chunk ("arbitrary")
    steps = pl.num_programs(1)
    n, w = accp_ref.shape           # batch rows, fixed accumulator lane width
    tk = queue_ref.shape[1]
    folds = tk // w

    @pl.when(k == 0)
    def _():
        accp_ref[...] = jnp.zeros_like(accp_ref)
        accn_ref[...] = jnp.zeros_like(accn_ref)

    # gamma * cosine-similarity tile: (N, tk). Inputs may be bf16; f32 accumulate.
    gd = GAMMA * jnp.dot(feat_ref[...], queue_ref[...],
                         preferred_element_type=jnp.float32)

    # Single full-tile transcendental.  |dist| <= ~1 (bf16 rounding can nudge it past
    # 1 by ~1e-2), so with the fixed shifts every retained term stays in [0, ~e^0.4].
    u = jnp.exp(gd)
    if approx_recip:                # EUP slot; only used off the exact-f32 test path
        pos_val = C_P * pl.reciprocal(u, approx=True)
    else:
        pos_val = C_P / u

    t = targets_ref[...]            # (N, 1)  int32
    lab = label_ref[...]            # (1, tk) int32
    is_pos = t == lab

    e_p = jnp.where(is_pos, pos_val, 0.0)   # exp(logit_p - SHIFT_P), 0 where masked
    e_n = jnp.where(is_pos, 0.0, u * C_N)   # exp(logit_n - SHIFT_N), 0 where masked

    # Fold the (N, tk) tile into the fixed-width (N, w) accumulators in registers
    # (short unrolled loop of static-sliced VPU adds), then store once.
    accp = accp_ref[...]
    accn = accn_ref[...]
    for j in range(folds):
        accp = accp + e_p[:, j * w:(j + 1) * w]
        accn = accn + e_n[:, j * w:(j + 1) * w]
    accp_ref[...] = accp
    accn_ref[...] = accn

    # Self-match exclusion: the batch sits at columns [ptr, ptr+N); only the tile(s)
    # overlapping that range pay for the iota/compare and the correction.
    ptr = ptr_ref[0]
    tile_start = (c * steps + k) * tk

    @pl.when(jnp.logical_and(ptr < tile_start + tk, ptr + n > tile_start))
    def _():
        col = lax.broadcasted_iota(jnp.int32, (n, tk), 1) + tile_start
        row = lax.broadcasted_iota(jnp.int32, (n, tk), 0)
        corr = jnp.where(jnp.logical_and(is_pos, col == row + ptr), e_p, 0.0)
        a = accp_ref[...]
        for j in range(folds):
            a = a - corr[:, j * w:(j + 1) * w]
        accp_ref[...] = a


def _choose_tiling(N, dim, K, qbytes, tk, num_cores):
    """Generation-aware K-tile / core-split / VMEM-limit selection."""
    vmem_cap, num_tc = _tpu_hw()
    if vmem_cap >= 96 * 2**20:       # 128-MiB parts (v5e / v6e): push tk large
        vmem_budget, vmem_limit_cap = 88 * 2**20, 100 * 2**20
    else:                            # v7x (64 MiB/TC): leave Mosaic headroom
        vmem_budget, vmem_limit_cap = 36 * 2**20, 52 * 2**20

    qbuf = 3 if _HAS_BUFFERED else 2   # streamed queue/label depth (conservative)
    fbuf = 1 if _HAS_BUFFERED else 2   # resident feat_q / targets
    npad = max(N, 8)

    def vmem_estimate(tk_):
        w = math.gcd(tk_, ACC_W)
        return (qbuf * dim * tk_ * qbytes        # streamed queue tiles
                + qbuf * 8 * tk_ * 4             # streamed label tiles (sublane pad)
                + fbuf * npad * dim * qbytes     # resident feat_q
                + fbuf * npad * 128 * 4          # resident targets (lane pad)
                + 2 * 2 * npad * w * 4           # two fixed-width f32 accumulators
                + (2 << 20))                     # Mosaic internal slack

    if tk is None:
        for cand in (16384, 8192, 4096, 2048, 1024, 512, 256, 128):
            if cand <= K and K % cand == 0 and vmem_estimate(cand) <= vmem_budget:
                tk = cand
                break
        else:
            tk = K if K <= 128 else 128
    assert K % tk == 0, (K, tk)
    assert tk == K or tk % 128 == 0, tk
    if num_cores is None:            # split the K axis across TCs only on v7x
        num_cores = num_tc if (K // tk) % num_tc == 0 else 1
    assert (K // tk) % num_cores == 0, (K, tk, num_cores)
    acc_w = math.gcd(tk, ACC_W)
    vmem_limit = int(min(max(2 * vmem_estimate(tk), 32 * 2**20), vmem_limit_cap))
    return tk, num_cores, acc_w, vmem_limit


def pairwise_cosface_pallas(feat_q, targets, queue, queue_label, ptr, *,
                            tk=None, num_cores=None):
    """feat_q: (N, dim) already normalized (f32 or bf16); queue: (dim, K);
    queue_label: (1, K) int; ptr: scalar column where the batch was enqueued."""
    N, dim = feat_q.shape
    K = queue.shape[1]
    qbytes = jnp.dtype(queue.dtype).itemsize
    tk, num_cores, acc_w, vmem_limit = _choose_tiling(N, dim, K, qbytes, tk, num_cores)
    steps = K // (num_cores * tk)

    feat_q = feat_q.astype(queue.dtype)
    targets2d = targets.reshape(N, 1).astype(jnp.int32)
    labels = queue_label.astype(jnp.int32)
    ptr_arr = jnp.reshape(jnp.asarray(ptr, dtype=jnp.int32), (1,))

    def kq_index(c, k, p):      # queue / label tiles walk the global K axis
        return (0, c * steps + k)

    def fixed_index(c, k, p):   # feat / targets stay resident
        return (0, 0)

    def out_index(c, k, p):     # per-core accumulator block, resident across k
        return (c, 0, 0)

    stream_buf = 3 if steps >= 3 else None   # deeper queue stream only when useful

    cost = pl.CostEstimate(
        flops=2 * N * dim * K,
        transcendentals=N * K,
        bytes_accessed=dim * K * qbytes + K * 4 + N * dim * qbytes
        + 2 * num_cores * N * acc_w * 4)

    kernel = functools.partial(_cosface_kernel,
                               approx_recip=queue.dtype != jnp.float32)

    acc_p, acc_n = pl.pallas_call(
        kernel,
        out_shape=(jax.ShapeDtypeStruct((num_cores, N, acc_w), jnp.float32),
                   jax.ShapeDtypeStruct((num_cores, N, acc_w), jnp.float32)),
        grid_spec=pltpu.PrefetchScalarGridSpec(
            num_scalar_prefetch=1,                 # queue_ptr -> SMEM
            grid=(num_cores, steps),
            in_specs=[
                _spec((N, 1), fixed_index, buffers=1),          # targets (resident)
                _spec((N, dim), fixed_index, buffers=1),        # feat_q (resident)
                _spec((dim, tk), kq_index, buffers=stream_buf),  # queue tile stream
                _spec((1, tk), kq_index, buffers=stream_buf),    # label tile stream
            ],
            out_specs=[
                pl.BlockSpec((None, N, acc_w), out_index),   # pos exp-sum accumulator
                pl.BlockSpec((None, N, acc_w), out_index),   # neg exp-sum accumulator
            ],
        ),
        compiler_params=pltpu.CompilerParams(
            dimension_semantics=("parallel", "arbitrary"),
            vmem_limit_bytes=vmem_limit),
        cost_estimate=cost,
    )(ptr_arr, targets2d, feat_q, queue, labels)

    # Single small cross-lane / cross-core reduction + log / softplus / mean in glue.
    sum_p = jnp.sum(acc_p, axis=(0, 2))
    sum_n = jnp.sum(acc_n, axis=(0, 2))
    # Guarded logs: rows with no positives after self-exclusion (or no negatives)
    # keep the reference forward value (softplus(-inf) = 0) while the double-where
    # keeps any future gradient through the log NaN-free.
    lse_p = jnp.where(sum_p > 0,
                      SHIFT_P + jnp.log(jnp.where(sum_p > 0, sum_p, 1.0)), -jnp.inf)
    lse_n = jnp.where(sum_n > 0,
                      SHIFT_N + jnp.log(jnp.where(sum_n > 0, sum_n, 1.0)), -jnp.inf)
    return jnp.mean(jax.nn.softplus(lse_p + lse_n))


def memory_forward(feat_q, targets, queue, queue_label, queue_ptr, *,
                   tk=None, num_cores=None):
    """Functional equivalent of Memory.forward (single-worker path).

    Returns (loss, (new_queue, new_queue_label, new_queue_ptr)).  Jit with
    donate_argnums=(2, 3, 4) so the enqueue is an in-place HBM update instead of a
    full-queue copy.  Keeping the queue state in bf16 (the default in
    init_memory_state) halves both the enqueue write and the kernel's queue stream;
    the kernel accumulates in f32."""
    # TODO(synk): multi-worker concat_all_gather branch of _dequeue_and_enqueue is
    # not implemented (single-worker path only).
    feat_q = feat_q.astype(jnp.float32)
    feat_q = feat_q * lax.rsqrt(
        jnp.sum(feat_q * feat_q, axis=1, keepdims=True) + 1e-24)

    N = feat_q.shape[0]
    K = queue.shape[1]
    assert K % N == 0, (K, N)   # same assert as the module; also guarantees the
                                # enqueued batch never wraps past column K.
    ptr = queue_ptr[0].astype(jnp.int32)

    feat_k = feat_q.astype(queue.dtype)
    queue = lax.dynamic_update_slice(queue, feat_k.T, (0, ptr))
    queue_label = lax.dynamic_update_slice(
        queue_label, targets.reshape(1, N).astype(queue_label.dtype), (0, ptr))
    new_ptr = jnp.mod(ptr + N, K).astype(queue_ptr.dtype).reshape(1)

    loss = pairwise_cosface_pallas(feat_k, targets, queue, queue_label, ptr,
                                   tk=tk, num_cores=num_cores)
    return loss, (queue, queue_label, new_ptr)


def init_memory_state(key, dim, K, *, dtype=jnp.bfloat16, label_dtype=jnp.int32):
    """Queue buffers; bf16 storage by default (halves the dominant HBM stream)."""
    q = jax.random.normal(key, (dim, K), dtype=jnp.float32)
    q = q * lax.rsqrt(jnp.sum(q * q, axis=0, keepdims=True))
    return (q.astype(dtype),
            jnp.zeros((1, K), dtype=label_dtype),     # torch.long -> int32 on TPU
            jnp.zeros((1,), dtype=jnp.int32))


def _reference_loss(feat_q, targets, queue, queue_label, ptr):
    """Pure-JAX f32 reference of Memory.forward's loss (post-enqueue buffers).
    Self-match exclusion is placed at the enqueued columns [ptr, ptr+N); for
    ptr == 0 this is exactly the PyTorch module's _pairwise_cosface."""
    feat_q = feat_q.astype(jnp.float32)
    feat_q = feat_q * lax.rsqrt(
        jnp.sum(feat_q * feat_q, axis=1, keepdims=True) + 1e-24)
    N = feat_q.shape[0]
    K = queue.shape[1]
    queue = lax.dynamic_update_slice(queue.astype(jnp.float32), feat_q.T, (0, ptr))
    queue_label = lax.dynamic_update_slice(
        queue_label, targets.reshape(1, N).astype(queue_label.dtype), (0, ptr))
    dist = feat_q @ queue
    is_pos = (targets.reshape(N, 1) == queue_label).astype(jnp.float32)
    is_neg = 1.0 - is_pos
    col = jnp.arange(K)[None, :]
    row = jnp.arange(N)[:, None]
    same = (col == row + ptr).astype(jnp.float32)
    is_pos = is_pos - same
    logit_p = -GAMMA * dist * is_pos + NEG_BIG * (1.0 - is_pos)
    logit_n = GAMMA * (dist * is_neg + MARGIN) + NEG_BIG * (1.0 - is_neg)
    lse_p = jax.scipy.special.logsumexp(logit_p, axis=1)
    lse_n = jax.scipy.special.logsumexp(logit_n, axis=1)
    return jnp.mean(jax.nn.softplus(lse_p + lse_n))


if __name__ == "__main__":
    # Small but representative shapes: batch N=8, dim=64, queue K=2048.
    N, DIM, K = 8, 64, 2048
    key = jax.random.PRNGKey(0)
    k1, k2, k3 = jax.random.split(key, 3)

    queue_f32, queue_label, ptr0 = init_memory_state(k1, DIM, K, dtype=jnp.float32)
    feat_q = jax.random.normal(k2, (N, DIM), dtype=jnp.float32)
    targets = jax.random.randint(k3, (N,), 0, 4, dtype=jnp.int32)

    # --- Test 1: f32 queue, ptr = 0, explicit multi-tile / 2-chunk grid -------------
    # (exercises accumulator folding, the "parallel" chunk axis, self-mask in chunk 0)
    fwd_f32 = jax.jit(functools.partial(memory_forward, tk=512, num_cores=2))
    loss0, _ = fwd_f32(feat_q, targets, queue_f32, queue_label, ptr0)
    jax.block_until_ready(loss0)
    ref0 = _reference_loss(feat_q, targets, queue_f32, queue_label, 0)
    assert jnp.allclose(loss0, ref0, rtol=1e-4, atol=1e-4), (loss0, ref0)

    # --- Test 2: f32 queue, ptr = K - N (self-mask lands in the last tile / 2nd chunk)
    ptr1 = jnp.full((1,), K - N, dtype=jnp.int32)
    loss1, _ = fwd_f32(feat_q, targets, queue_f32, queue_label, ptr1)
    jax.block_until_ready(loss1)
    ref1 = _reference_loss(feat_q, targets, queue_f32, queue_label, K - N)
    assert jnp.allclose(loss1, ref1, rtol=1e-4, atol=1e-4), (loss1, ref1)

    # --- Test 3: production config: bf16 queue state (default), donated buffers,
    #             generation-aware auto tiling / core split, approx reciprocal --------
    queue_bf16, queue_label_b, ptr0b = init_memory_state(k1, DIM, K)
    fwd_prod = jax.jit(memory_forward, donate_argnums=(2, 3, 4))
    loss2, (new_q, new_lbl, new_ptr) = fwd_prod(
        feat_q, targets, queue_bf16, queue_label_b, ptr0b)
    jax.block_until_ready(loss2)
    assert jnp.allclose(loss2, ref0, rtol=5e-2, atol=5e-2), (loss2, ref0)
    assert int(new_ptr[0]) == N

    print("KERNEL_OK")
</pallas_src>

<mosaic_0001>
module attributes {stable_mosaic.version = 11 : i64} {
  func.func @_cosface_kernel(%arg0: i32, %arg1: i32, %arg2: memref<1xi32, #tpu.memory_space<smem>>, %arg3: memref<8x1xi32, #tpu.memory_space<vmem>>, %arg4: memref<8x64xf32, #tpu.memory_space<vmem>>, %arg5: memref<64x512xf32, #tpu.memory_space<vmem>>, %arg6: memref<1x512xi32, #tpu.memory_space<vmem>>, %arg7: memref<1x8x512xf32, #tpu.memory_space<vmem>>, %arg8: memref<1x8x512xf32, #tpu.memory_space<vmem>>) attributes {dimension_semantics = [#tpu.dimension_semantics<parallel>, #tpu.dimension_semantics<arbitrary>], iteration_bounds = array<i64: 2, 2>, scalar_prefetch = 1 : i64, scratch_operands = 0 : i64, tpu.core_type = #tpu.core_type<tc>, window_params = [{pipeline_mode = #tpu.pipeline_mode<synchronous>, transform_indices = @transform_0, window_bounds = array<i64: 8, 1>}, {pipeline_mode = #tpu.pipeline_mode<synchronous>, transform_indices = @transform_1, window_bounds = array<i64: 8, 64>}, {transform_indices = @transform_2, window_bounds = array<i64: 64, 512>}, {transform_indices = @transform_3, window_bounds = array<i64: 1, 512>}, {transform_indices = @transform_4, window_bounds = array<i64: 1, 8, 512>}, {transform_indices = @transform_5, window_bounds = array<i64: 1, 8, 512>}]} {
    %c0_i32 = arith.constant 0 : i32
    %0 = arith.cmpi eq, %arg1, %c0_i32 : i32
    %1 = arith.extui %0 : i1 to i32
    %c0_i32_0 = arith.constant 0 : i32
    %2 = arith.cmpi ne, %1, %c0_i32_0 : i32
    scf.if %2 {
      %cst_28 = arith.constant 0.000000e+00 : f32
      %45 = vector.broadcast %cst_28 : f32 to vector<8x512xf32>
      %c0_29 = arith.constant 0 : index
      %c0_30 = arith.constant 0 : index
      %c0_31 = arith.constant 0 : index
      %46 = vector.load %arg7[%c0_29, %c0_30, %c0_31] : memref<1x8x512xf32, #tpu.memory_space<vmem>>, vector<1x8x512xf32>
      %47 = vector.shape_cast %46 : vector<1x8x512xf32> to vector<8x512xf32>
      %48 = vector.shape_cast %45 : vector<8x512xf32> to vector<1x8x512xf32>
      tpu.vector_store %arg7[%c0_29, %c0_30, %c0_31], %48 {strides = array<i32>} : memref<1x8x512xf32, #tpu.memory_space<vmem>>, vector<1x8x512xf32>,
      %cst_32 = arith.constant 0.000000e+00 : f32
      %49 = vector.broadcast %cst_32 : f32 to vector<8x512xf32>
      %c0_33 = arith.constant 0 : index
      %c0_34 = arith.constant 0 : index
      %c0_35 = arith.constant 0 : index
      %50 = vector.load %arg8[%c0_33, %c0_34, %c0_35] : memref<1x8x512xf32, #tpu.memory_space<vmem>>, vector<1x8x512xf32>
      %51 = vector.shape_cast %50 : vector<1x8x512xf32> to vector<8x512xf32>
      %52 = vector.shape_cast %49 : vector<8x512xf32> to vector<1x8x512xf32>
      tpu.vector_store %arg8[%c0_33, %c0_34, %c0_35], %52 {strides = array<i32>} : memref<1x8x512xf32, #tpu.memory_space<vmem>>, vector<1x8x512xf32>,
    } else {
    }
    %c0 = arith.constant 0 : index
    %c0_1 = arith.constant 0 : index
    %3 = vector.load %arg4[%c0, %c0_1] : memref<8x64xf32, #tpu.memory_space<vmem>>, vector<8x64xf32>
    %c0_2 = arith.constant 0 : index
    %c0_3 = arith.constant 0 : index
    %4 = vector.load %arg5[%c0_2, %c0_3] : memref<64x512xf32, #tpu.memory_space<vmem>>, vector<64x512xf32>
    %cst = arith.constant dense<0.000000e+00> : vector<8x512xf32>
    %5 = tpu.matmul %3, %4, %cst {dimension_numbers = #tpu.dot_dimension_numbers<[1], [0], [0], [1], [0, 0, 1, 1], [], []>} : vector<8x64xf32>, vector<64x512xf32>, vector<8x512xf32> -> vector<8x512xf32>
    %cst_4 = arith.constant 3.200000e+01 : f32
    %6 = vector.broadcast %cst_4 : f32 to vector<8x512xf32>
    %7 = arith.mulf %6, %5 : vector<8x512xf32>
    %8 = math.exp %7 : vector<8x512xf32>
    %cst_5 = arith.constant 1.26641658E-14 : f32
    %9 = vector.broadcast %cst_5 : f32 to vector<8x512xf32>
    %10 = arith.divf %9, %8 : vector<8x512xf32>
    %c0_6 = arith.constant 0 : index
    %c0_7 = arith.constant 0 : index
    %11 = vector.load %arg3[%c0_6, %c0_7] : memref<8x1xi32, #tpu.memory_space<vmem>>, vector<8x1xi32>
    %c0_8 = arith.constant 0 : index
    %c0_9 = arith.constant 0 : index
    %12 = vector.load %arg6[%c0_8, %c0_9] : memref<1x512xi32, #tpu.memory_space<vmem>>, vector<1x512xi32>
    %13 = vector.broadcast %11 : vector<8x1xi32> to vector<8x512xi32>
    %14 = vector.broadcast %12 : vector<1x512xi32> to vector<8x512xi32>
    %15 = arith.cmpi eq, %13, %14 : vector<8x512xi32>
    %cst_10 = arith.constant 0.000000e+00 : f32
    %16 = vector.broadcast %cst_10 : f32 to vector<8x512xf32>
    %17 = arith.select %15, %10, %16 : vector<8x512xi1>, vector<8x512xf32>
    %cst_11 = arith.constant 1.26641658E-14 : f32
    %18 = vector.broadcast %cst_11 : f32 to vector<8x512xf32>
    %19 = arith.mulf %8, %18 : vector<8x512xf32>
    %cst_12 = arith.constant 0.000000e+00 : f32
    %20 = vector.broadcast %cst_12 : f32 to vector<8x512xf32>
    %21 = arith.select %15, %20, %19 : vector<8x512xi1>, vector<8x512xf32>
    %c0_13 = arith.constant 0 : index
    %c0_14 = arith.constant 0 : index
    %c0_15 = arith.constant 0 : index
    %22 = vector.load %arg7[%c0_13, %c0_14, %c0_15] : memref<1x8x512xf32, #tpu.memory_space<vmem>>, vector<1x8x512xf32>
    %23 = vector.shape_cast %22 : vector<1x8x512xf32> to vector<8x512xf32>
    %c0_16 = arith.constant 0 : index
    %c0_17 = arith.constant 0 : index
    %c0_18 = arith.constant 0 : index
    %24 = vector.load %arg8[%c0_16, %c0_17, %c0_18] : memref<1x8x512xf32, #tpu.memory_space<vmem>>, vector<1x8x512xf32>
    %25 = vector.shape_cast %24 : vector<1x8x512xf32> to vector<8x512xf32>
    %26 = arith.addf %23, %17 : vector<8x512xf32>
    %27 = arith.addf %25, %21 : vector<8x512xf32>
    %c0_19 = arith.constant 0 : index
    %c0_20 = arith.constant 0 : index
    %c0_21 = arith.constant 0 : index
    %28 = vector.load %arg7[%c0_19, %c0_20, %c0_21] : memref<1x8x512xf32, #tpu.memory_space<vmem>>, vector<1x8x512xf32>
    %29 = vector.shape_cast %28 : vector<1x8x512xf32> to vector<8x512xf32>
    %30 = vector.shape_cast %26 : vector<8x512xf32> to vector<1x8x512xf32>
    tpu.vector_store %arg7[%c0_19, %c0_20, %c0_21], %30 {strides = array<i32>} : memref<1x8x512xf32, #tpu.memory_space<vmem>>, vector<1x8x512xf32>,
    %c0_22 = arith.constant 0 : index
    %c0_23 = arith.constant 0 : index
    %c0_24 = arith.constant 0 : index
    %31 = vector.load %arg8[%c0_22, %c0_23, %c0_24] : memref<1x8x512xf32, #tpu.memory_space<vmem>>, vector<1x8x512xf32>
    %32 = vector.shape_cast %31 : vector<1x8x512xf32> to vector<8x512xf32>
    %33 = vector.shape_cast %27 : vector<8x512xf32> to vector<1x8x512xf32>
    tpu.vector_store %arg8[%c0_22, %c0_23, %c0_24], %33 {strides = array<i32>} : memref<1x8x512xf32, #tpu.memory_space<vmem>>, vector<1x8x512xf32>,
    %c0_25 = arith.constant 0 : index
    %34 = memref.load %arg2[%c0_25] : memref<1xi32, #tpu.memory_space<smem>>
    %c2_i32 = arith.constant 2 : i32
    %35 = arith.muli %arg0, %c2_i32 : i32
    %36 = arith.addi %35, %arg1 : i32
    %c512_i32 = arith.constant 512 : i32
    %37 = arith.muli %36, %c512_i32 : i32
    %c512_i32_26 = arith.constant 512 : i32
    %38 = arith.addi %37, %c512_i32_26 : i32
    %39 = arith.cmpi slt, %34, %38 : i32
    %c8_i32 = arith.constant 8 : i32
    %40 = arith.addi %34, %c8_i32 : i32
    %41 = arith.cmpi sgt, %40, %37 : i32
    %42 = arith.andi %39, %41 : i1
    %43 = arith.extui %42 : i1 to i32
    %c0_i32_27 = arith.constant 0 : i32
    %44 = arith.cmpi ne, %43, %c0_i32_27 : i32
    scf.if %44 {
      %45 = tpu.iota {dimensions = array<i32: 1>} : vector<8x512xi32>
      %46 = vector.broadcast %37 : i32 to vector<8x512xi32>
      %47 = arith.addi %45, %46 : vector<8x512xi32>
      %48 = tpu.iota {dimensions = array<i32: 0>} : vector<8x512xi32>
      %49 = vector.broadcast %34 : i32 to vector<8x512xi32>
      %50 = arith.addi %48, %49 : vector<8x512xi32>
      %51 = arith.cmpi eq, %47, %50 : vector<8x512xi32>
      %52 = arith.andi %15, %51 : vector<8x512xi1>
      %cst_28 = arith.constant 0.000000e+00 : f32
      %53 = vector.broadcast %cst_28 : f32 to vector<8x512xf32>
      %54 = arith.select %52, %17, %53 : vector<8x512xi1>, vector<8x512xf32>
      %c0_29 = arith.constant 0 : index
      %c0_30 = arith.constant 0 : index
      %c0_31 = arith.constant 0 : index
      %55 = vector.load %arg7[%c0_29, %c0_30, %c0_31] : memref<1x8x512xf32, #tpu.memory_space<vmem>>, vector<1x8x512xf32>
      %56 = vector.shape_cast %55 : vector<1x8x512xf32> to vector<8x512xf32>
      %57 = arith.subf %56, %54 : vector<8x512xf32>
      %c0_32 = arith.constant 0 : index
      %c0_33 = arith.constant 0 : index
      %c0_34 = arith.constant 0 : index
      %58 = vector.load %arg7[%c0_32, %c0_33, %c0_34] : memref<1x8x512xf32, #tpu.memory_space<vmem>>, vector<1x8x512xf32>
      %59 = vector.shape_cast %58 : vector<1x8x512xf32> to vector<8x512xf32>
      %60 = vector.shape_cast %57 : vector<8x512xf32> to vector<1x8x512xf32>
      tpu.vector_store %arg7[%c0_32, %c0_33, %c0_34], %60 {strides = array<i32>} : memref<1x8x512xf32, #tpu.memory_space<vmem>>, vector<1x8x512xf32>,
    } else {
    }
    return
  }
  func.func @transform_0(%arg0: i32, %arg1: i32, %arg2: memref<1xi32, #tpu.memory_space<smem>>) -> (i32, i32) {
    %c0_i32 = arith.constant 0 : i32
    %c0_i32_0 = arith.constant 0 : i32
    %c0_i32_1 = arith.constant 0 : i32
    return %c0_i32, %c0_i32_0 : i32, i32
  }
  func.func @transform_1(%arg0: i32, %arg1: i32, %arg2: memref<1xi32, #tpu.memory_space<smem>>) -> (i32, i32) {
    %c0_i32 = arith.constant 0 : i32
    %c0_i32_0 = arith.constant 0 : i32
    %c0_i32_1 = arith.constant 0 : i32
    return %c0_i32, %c0_i32_0 : i32, i32
  }
  func.func @transform_2(%arg0: i32, %arg1: i32, %arg2: memref<1xi32, #tpu.memory_space<smem>>) -> (i32, i32) {
    %c2_i32 = arith.constant 2 : i32
    %0 = arith.muli %arg0, %c2_i32 : i32
    %1 = arith.addi %0, %arg1 : i32
    %c0_i32 = arith.constant 0 : i32
    %c0_i32_0 = arith.constant 0 : i32
    return %c0_i32, %1 : i32, i32
  }
  func.func @transform_3(%arg0: i32, %arg1: i32, %arg2: memref<1xi32, #tpu.memory_space<smem>>) -> (i32, i32) {
    %c2_i32 = arith.constant 2 : i32
    %0 = arith.muli %arg0, %c2_i32 : i32
    %1 = arith.addi %0, %arg1 : i32
    %c0_i32 = arith.constant 0 : i32
    %c0_i32_0 = arith.constant 0 : i32
    return %c0_i32, %1 : i32, i32
  }
  func.func @transform_4(%arg0: i32, %arg1: i32, %arg2: memref<1xi32, #tpu.memory_space<smem>>) -> (i32, i32, i32) {
    %c0_i32 = arith.constant 0 : i32
    %c0_i32_0 = arith.constant 0 : i32
    %c0_i32_1 = arith.constant 0 : i32
    return %arg0, %c0_i32, %c0_i32_0 : i32, i32, i32
  }
  func.func @transform_5(%arg0: i32, %arg1: i32, %arg2: memref<1xi32, #tpu.memory_space<smem>>) -> (i32, i32, i32) {
    %c0_i32 = arith.constant 0 : i32
    %c0_i32_0 = arith.constant 0 : i32
    %c0_i32_1 = arith.constant 0 : i32
    return %arg0, %c0_i32, %c0_i32_0 : i32, i32, i32
  }
}

</mosaic_0001>

<bundles_post_ra>
// kernel: memory_forward.1
= control target key start
LH: loop header
LB: loop body
LE: loop exit
PB: predicated region body
PF: predicated region fallthrough
CT: control target
= control target key end

     0   :  { %s1391_s0 = inlined_call_operand.<no memory space> [shape: s32[1], index: 0, kind: input, shape index: {}]   ;;  %s1392_s1 = inlined_call_operand.vmem [shape: s32[8,1], index: 1, kind: input, shape index: {}]   ;;  %s1393_s2 = inlined_call_operand.vmem [shape: f32[8,64], index: 2, kind: input, shape index: {}]   ;;  %s1394_s3 = inlined_call_operand.vmem [shape: f32[64,2048], index: 3, kind: input, shape index: {}]   ;;  %s1395_s4 = inlined_call_operand.vmem [shape: s32[1,2048], index: 4, kind: input, shape index: {}]   ;;  %s1396_s5 = inlined_call_operand.vmem [shape: f32[2,8,512], index: 5, kind: output, shape index: {0}]   ;;  %s1397_s6 = inlined_call_operand.vmem [shape: f32[2,8,512], index: 6, kind: output, shape index: {1}]  }
   0x1   :  { %12 = sst [smem:[#allocation3]] %s1391_s0 }
   0x2   :  { %s1049_s23 = smov 0   ;;  %s1051_s24 = smov 0  }
   0x3   :  { %s1053_s25 = smov 0   ;;  %s1055_s26 = smov 0  }
   0x4   :  { %s1057_s27 = smov 0   ;;  %s1059_s28 = smov 0  }
   0x5   :  { %s1061_s29 = smov 0  }
   0x6 LB: > { %s27_s0 = sadd.s32 1, %s998_s27  ;;  %s30_s30 = sadd.s32 1, %s1002_s28  ;;  %s1006_s29 = sphi %s1061_s29, %s18_s29   ;;  %s1002_s28 = sphi %s1059_s28, %s1405_s28   ;;  %s998_s27 = sphi %s1057_s27, %s1404_s27   ;;  %s994_s26 = sphi %s1055_s26, %s1403_s26   ;;  %s990_s25 = sphi %s1053_s25, %s1402_s25   ;;  %s986_s24 = sphi %s1051_s24, %s1401_s24   ;;  %s982_s23 = sphi %s1049_s23, %s1400_s23  }
   0x7   : > { %p28_p0 = scmp.ge.s32.totalorder %s27_s0, 2  ;;  %p90_p1 = scmp.ne.s32.totalorder %s986_s24, %s982_s23 }
   0x8   : > { %p91_p2 = scmp.eq.s32.totalorder %s1006_s29, 0  ;;  %s816_s7 = sshll.u32 %s1002_s28, 1 }
   0x9   : > { %s1407_s0 = smov (%p28_p0, %s27_s0), 0  ;;  %s1409_s30 = smov (!%p28_p0, %s30_s30), %s1002_s28 }
   0xa   : > { %p32_p3 = scmp.ge.s32.totalorder %s1409_s30, 2  ;;  %p92_p4 = por %p91_p2, %p90_p1 }
   0xb   : > { %s77_s8 = sadd.s32 %s998_s27, %s816_s7  ;;  %s83_s12 = sadd.s32 1, %s986_s24 }
   0xc   : > { %s1411_s30 = smov (%p32_p3, %s1409_s30), 0  ;;  %p821_p6 = scmp.ge.s32.totalorder %s1006_s29, 4 }
   0xd   : > { %s817_s9 = sshll.u32 %s1411_s30, 1 }
   0xe   : > { %s79_s10 = sadd.s32 %s817_s9, %s1407_s0  ;;  %204 = sbr.rel (%p821_p6) target bundleno = 41 (0x29), region = 24 }
   0xf   : > { %s80_s11 = ssub.s32 %s77_s8, %s79_s10 }
  0x10   : > { %p81_p5 = scmp.eq.s32.totalorder %s80_s11, 0 }
  0x12   : > { %s1100_s13 = scalar_select %p81_p5, %s986_s24, %s83_s12  }
  0x15   : > { %207 = sbr.rel (!%p92_p4) target bundleno = 41 (0x29), region = 28  ;;  %s209_s14 = sand.u32 (%p92_p4), 1, %s986_s24  }
  0x16   : > { %s841_s15 = sshll.u32 (%p92_p4), %s77_s8, 5  ;;  %s822_s16 = sshll.u32 (%p92_p4), %s209_s14, 8 }
  0x17   : > { %s1107_s19 = scalar_lea.vmem (%p92_p4), %s1394_s3, %s841_s15  ;;  %s1112_s20 = scalar_lea.vmem (%p92_p4), [#allocation4], %s822_s16 }
  0x18   : > { %v229_v0 = vld [vmem:[%s1107_s19] sm:$0xff] (%p92_p4)  ;;  %v231_v1 = vld [vmem:[%s1107_s19 + $0x8] sm:$0xff] (%p92_p4)  ;;  %v233_v2 = vld [vmem:[%s1107_s19 + $0x10] sm:$0xff] (%p92_p4) }
  0x19   : > { %230 = vst [vmem:[%s1112_s20] sm:$0xff] (%p92_p4), %v229_v0  ;;  %232 = vst [vmem:[%s1112_s20 + $0x8] sm:$0xff] (%p92_p4), %v231_v1  ;;  %v235_v3 = vld [vmem:[%s1107_s19 + $0x18] sm:$0xff] (%p92_p4)  ;;  %v237_v4 = vld [vmem:[%s1107_s19 + $0x80] sm:$0xff] (%p92_p4) }
  0x1a   : > { %234 = vst [vmem:[%s1112_s20 + $0x10] sm:$0xff] (%p92_p4), %v233_v2  ;;  %v239_v5 = vld [vmem:[%s1107_s19 + $0x88] sm:$0xff] (%p92_p4)  ;;  %236 = vst [vmem:[%s1112_s20 + $0x18] sm:$0xff] (%p92_p4), %v235_v3  ;;  %v241_v6 = vld [vmem:[%s1107_s19 + $0x90] sm:$0xff] (%p92_p4) }
  0x1b   : > { %238 = vst [vmem:[%s1112_s20 + $0x20] sm:$0xff] (%p92_p4), %v237_v4  ;;  %240 = vst [vmem:[%s1112_s20 + $0x28] sm:$0xff] (%p92_p4), %v239_v5  ;;  %v243_v7 = vld [vmem:[%s1107_s19 + $0x98] sm:$0xff] (%p92_p4)  ;;  %v245_v8 = vld [vmem:[%s1107_s19 + $0x100] sm:$0xff] (%p92_p4) }
  0x1c   : > { %242 = vst [vmem:[%s1112_s20 + $0x30] sm:$0xff] %v241_v6  ;;  %244 = vst [vmem:[%s1112_s20 + $0x38] sm:$0xff] %v243_v7  ;;  %v247_v9 = vld [vmem:[%s1107_s19 + $0x108] sm:$0xff]  ;;  %v249_v10 = vld [vmem:[%s1107_s19 + $0x110] sm:$0xff] }
  0x1d   : > { %246 = vst [vmem:[%s1112_s20 + $0x40] sm:$0xff] %v245_v8  ;;  %v251_v11 = vld [vmem:[%s1107_s19 + $0x118] sm:$0xff]  ;;  %248 = vst [vmem:[%s1112_s20 + $0x48] sm:$0xff] %v247_v9  ;;  %v253_v12 = vld [vmem:[%s1107_s19 + $0x180] sm:$0xff] }
  0x1e   : > { %250 = vst [vmem:[%s1112_s20 + $0x50] sm:$0xff] %v249_v10  ;;  %252 = vst [vmem:[%s1112_s20 + $0x58] sm:$0xff] %v251_v11  ;;  %v255_v13 = vld [vmem:[%s1107_s19 + $0x188] sm:$0xff]  ;;  %v257_v14 = vld [vmem:[%s1107_s19 + $0x190] sm:$0xff] }
  0x1f   : > { %254 = vst [vmem:[%s1112_s20 + $0x60] sm:$0xff] %v253_v12  ;;  %256 = vst [vmem:[%s1112_s20 + $0x68] sm:$0xff] %v255_v13  ;;  %v259_v15 = vld [vmem:[%s1107_s19 + $0x198] sm:$0xff]  ;;  %v261_v16 = vld [vmem:[%s1107_s19 + $0x200] sm:$0xff] }
  0x20   : > { %258 = vst [vmem:[%s1112_s20 + $0x70] sm:$0xff] %v257_v14  ;;  %v263_v17 = vld [vmem:[%s1107_s19 + $0x208] sm:$0xff]  ;;  %260 = vst [vmem:[%s1112_s20 + $0x78] sm:$0xff] %v259_v15  ;;  %v265_v18 = vld [vmem:[%s1107_s19 + $0x210] sm:$0xff] }
  0x21   : > { %262 = vst [vmem:[%s1112_s20 + $0x80] sm:$0xff] %v261_v16  ;;  %264 = vst [vmem:[%s1112_s20 + $0x88] sm:$0xff] %v263_v17  ;;  %v267_v19 = vld [vmem:[%s1107_s19 + $0x218] sm:$0xff]  ;;  %v269_v20 = vld [vmem:[%s1107_s19 + $0x280] sm:$0xff] }
  0x22   : > { %266 = vst [vmem:[%s1112_s20 + $0x90] sm:$0xff] %v265_v18  ;;  %268 = vst [vmem:[%s1112_s20 + $0x98] sm:$0xff] %v267_v19  ;;  %v271_v21 = vld [vmem:[%s1107_s19 + $0x288] sm:$0xff]  ;;  %v273_v22 = vld [vmem:[%s1107_s19 + $0x290] sm:$0xff] }
  0x23   : > { %270 = vst [vmem:[%s1112_s20 + $0xa0] sm:$0xff] %v269_v20  ;;  %v275_v23 = vld [vmem:[%s1107_s19 + $0x298] sm:$0xff]  ;;  %272 = vst [vmem:[%s1112_s20 + $0xa8] sm:$0xff] %v271_v21  ;;  %v277_v24 = vld [vmem:[%s1107_s19 + $0x300] sm:$0xff] }
  0x24   : > { %274 = vst [vmem:[%s1112_s20 + $0xb0] sm:$0xff] %v273_v22  ;;  %276 = vst [vmem:[%s1112_s20 + $0xb8] sm:$0xff] %v275_v23  ;;  %v279_v25 = vld [vmem:[%s1107_s19 + $0x308] sm:$0xff]  ;;  %v281_v26 = vld [vmem:[%s1107_s19 + $0x310] sm:$0xff] }
  0x25   : > { %278 = vst [vmem:[%s1112_s20 + $0xc0] sm:$0xff] %v277_v24  ;;  %280 = vst [vmem:[%s1112_s20 + $0xc8] sm:$0xff] %v279_v25  ;;  %v283_v27 = vld [vmem:[%s1107_s19 + $0x318] sm:$0xff]  ;;  %v285_v28 = vld [vmem:[%s1107_s19 + $0x380] sm:$0xff] }
  0x26   : > { %282 = vst [vmem:[%s1112_s20 + $0xd0] sm:$0xff] %v281_v26  ;;  %v287_v29 = vld [vmem:[%s1107_s19 + $0x388] sm:$0xff]  ;;  %284 = vst [vmem:[%s1112_s20 + $0xd8] sm:$0xff] %v283_v27  ;;  %v289_v30 = vld [vmem:[%s1107_s19 + $0x390] sm:$0xff] }
  0x27   : > { %286 = vst [vmem:[%s1112_s20 + $0xe0] sm:$0xff] %v285_v28  ;;  %288 = vst [vmem:[%s1112_s20 + $0xe8] sm:$0xff] %v287_v29  ;;  %v291_v31 = vld [vmem:[%s1107_s19 + $0x398] sm:$0xff] }
  0x28   : > { %290 = vst [vmem:[%s1112_s20 + $0xf0] sm:$0xff] %v289_v30  ;;  %292 = vst [vmem:[%s1112_s20 + $0xf8] sm:$0xff] %v291_v31 }
  0x29 PF: > { %p826_p7 = scmp.ge.s32.totalorder %s1006_s29, 1  ;;  %p309_p8 = scmp.lt.s32.totalorder %s1006_s29, 5 }
  0x2b   : > { %p310_p9 = pnand %p826_p7, %p309_p8 }
  0x2c   : > { %s316_s21 = sand.u32 (!%p310_p9), 1, %s982_s23   ;;  %s828_s22 = sshll.u32 (!%p310_p9), %s994_s26, 1 }
  0x2d   : > { %313 = sbr.rel (%p310_p9) target bundleno = 339 (0x153), region = 55  ;;  %s827_s7 = sshll.u32 (!%p310_p9), %s316_s21, 8 }
  0x2e   : > { %s1180_s8 = sadd.s32 (!%p310_p9), %s990_s25, %s828_s22  ;;  %p366_p11 = scmp.lt.s32.totalorder (!%p310_p9), %s994_s26, 1 }
  0x2f   : > { %s829_s9 = sshll.u32 (!%p310_p9), %s1180_s8, 2  ;;  %s1201_s20 = scalar_lea.vmem (!%p310_p9), [#allocation4], %s827_s7 }
  0x30   : > { %p360_p10 = scmp.lt.s32.totalorder (!%p310_p9), %s829_s9, 15  ;;  %p834_p12 = scmp.ne.s32.totalorder (!%p310_p9), %s990_s25, 0 }
  0x34   : > { %s1413_s9 = smov (!%p360_p10, %s829_s9), 15  ;;  %s1415_s26 = smov (!%p366_p11, %s994_s26), 1 }
  0x35   : > { %s362_s12 = scalar_lea.vmem %s1395_s4, %s1413_s9  ;;  %s842_s14 = sshll.u32 %s1415_s26, 5  ;;  %v1008_v32 = vmov (!%p834_p12), 0.0  }
  0x36   : > { %s1194_s23 = scalar_lea.vmem %s1396_s5, %s842_s14  ;;  %s1199_s19 = scalar_lea.vmem %s1397_s6, %s842_s14 }
  0x37   : > { %379 = sbr.rel (%p834_p12) target bundleno = 62 (0x3e), region = 63  ;;  %380 = vst [vmem:[%s1194_s23] sm:$0xff] (!%p834_p12), %v1008_v32  ;;  %381 = vst [vmem:[%s1194_s23 + $0x8] sm:$0xff] (!%p834_p12), %v1008_v32 }
  0x38   : > { %382 = vst [vmem:[%s1194_s23 + $0x10] sm:$0xff] (!%p834_p12), %v1008_v32  ;;  %383 = vst [vmem:[%s1194_s23 + $0x18] sm:$0xff] (!%p834_p12), %v1008_v32 }
  0x39   : > { %384 = vst [vmem:[%s1199_s19] sm:$0xff] (!%p834_p12), %v1008_v32  ;;  %385 = vst [vmem:[%s1199_s19 + $0x8] sm:$0xff] (!%p834_p12), %v1008_v32 }
  0x3a   : > { %386 = vst [vmem:[%s1199_s19 + $0x10] sm:$0xff] (!%p834_p12), %v1008_v32  ;;  %387 = vst [vmem:[%s1199_s19 + $0x18] sm:$0xff] (!%p834_p12), %v1008_v32 }
  0x3e PF: > { %v390_v33 = vld [vmem:[%s1201_s20 + $0x8] sm:$0xff]  ;;  %v392_v35 = vld [vmem:[%s1201_s20 + $0x18] sm:$0xff]  ;;  %v389_v38 = vld [vmem:[%s1201_s20] sm:$0xff]  ;;  %v1009_v40 = vmov 0.0   ;;  %v1010_v46 = vmov 0   ;;  %vm421_vm0 = vcmask 523264   ;;  %v592_v21 = vlaneseq }
  0x3f   : > { %v394_v34 = vld [vmem:[%s1201_s20 + $0x28] sm:$0xff]  ;;  %v396_v37 = vld [vmem:[%s1201_s20 + $0x38] sm:$0xff]  ;;  %v393_v39 = vld [vmem:[%s1201_s20 + $0x20] sm:$0xff]  ;;  %489 = vmatprep.mubr.f32.mxu0 %v1009_v40  ;;  %560 = vmatprep.mubr.f32.mxu1 %v1009_v40  ;;  %s1250_s7 = sld [smem:[#allocation3]]  ;;  %s1253_s10 = sshll.u32 %s1180_s8, 9 }
  0x40   : > { %v844_v36 = vpack.c.bf16 %v394_v34, %v390_v33  ;;  %v860_v41 = vpack.c.bf16 %v396_v37, %v392_v35  ;;  %v846_v42 = vpack.c.bf16 %v393_v39, %v389_v38  ;;  %v391_v43 = vld [vmem:[%s1201_s20 + $0x10] sm:$0xff]  ;;  %v398_v45 = vld [vmem:[%s1201_s20 + $0x48] sm:$0xff]  ;;  %935 = vset.pattern.permute.xlu0 %v1010_v46  ;;  %v400_v49 = vld [vmem:[%s1201_s20 + $0x58] sm:$0xff]  ;;  %s652_s11 = sadd.s32 512, %s1253_s10  ;;  %v1272_v31 = vshrl.u32 %v592_v21, 7 }
  0x41   : > { %v395_v44 = vld [vmem:[%s1201_s20 + $0x30] sm:$0xff]  ;;  %v402_v48 = vld [vmem:[%s1201_s20 + $0x68] sm:$0xff]  ;;  %v404_v50 = vld [vmem:[%s1201_s20 + $0x78] sm:$0xff] }
  0x42   : > { %845 = vmatprep.subr.bf16.mxu0 %v844_v36  ;;  %v862_v47 = vpack.c.bf16 %v395_v44, %v391_v43  ;;  %861 = vmatprep.subr.bf16.mxu1 %v860_v41  ;;  %v848_v51 = vpack.c.bf16 %v402_v48, %v398_v45  ;;  %v864_v52 = vpack.c.bf16 %v404_v50, %v400_v49  ;;  %v397_v53 = vld [vmem:[%s1201_s20 + $0x40] sm:$0xff]  ;;  %v399_v55 = vld [vmem:[%s1201_s20 + $0x50] sm:$0xff]  ;;  %v406_v58 = vld [vmem:[%s1201_s20 + $0x88] sm:$0xff]  ;;  %v594_v35 = vsub.s32 0, %v1272_v31 }
  0x43   : > { %847 = vmatpush1.bf16.msra.mxu0 %v846_v42  ;;  %v401_v54 = vld [vmem:[%s1201_s20 + $0x60] sm:$0xff]  ;;  %v403_v57 = vld [vmem:[%s1201_s20 + $0x70] sm:$0xff]  ;;  %v410_v59 = vld [vmem:[%s1201_s20 + $0xa8] sm:$0xff]  ;;  %v602_v37 = vsub.s32 2, %v1272_v31  ;;  %v598_v38 = vsub.s32 1, %v1272_v31  ;;  %v606_v39 = vsub.s32 3, %v1272_v31 }
  0x44   : > { %863 = vmatpush1.bf16.msra.mxu1 %v862_v47  ;;  %v850_v56 = vpack.c.bf16 %v401_v54, %v397_v53  ;;  %849 = vmatprep.subr.bf16.mxu0 %v848_v51  ;;  %v866_v60 = vpack.c.bf16 %v403_v57, %v399_v55  ;;  %v852_v61 = vpack.c.bf16 %v410_v59, %v406_v58  ;;  %v408_v62 = vld [vmem:[%s1201_s20 + $0x98] sm:$0xff]  ;;  %v405_v0 = vld [vmem:[%s1201_s20 + $0x80] sm:$0xff]  ;;  %v407_v3 = vld [vmem:[%s1201_s20 + $0x90] sm:$0xff] }
  0x45   : > { %865 = vmatprep.subr.bf16.mxu1 %v864_v52  ;;  %v412_v63 = vld [vmem:[%s1201_s20 + $0xb8] sm:$0xff]  ;;  %v409_v2 = vld [vmem:[%s1201_s20 + $0xa0] sm:$0xff]  ;;  %v411_v4 = vld [vmem:[%s1201_s20 + $0xb0] sm:$0xff]  ;;  %s654_s14 = sadd.s32 8, %s1250_s7  ;;  %p1258_p13 = scmp.lt.s32.totalorder %s1250_s7, %s652_s11 }
  0x46   : > { %v868_v1 = vpack.c.bf16 %v412_v63, %v408_v62  ;;  %v854_v5 = vpack.c.bf16 %v409_v2, %v405_v0  ;;  %v414_v6 = vld [vmem:[%s1201_s20 + $0xc8] sm:$0xff]  ;;  %v416_v8 = vld [vmem:[%s1201_s20 + $0xd8] sm:$0xff]  ;;  %v870_v9 = vpack.c.bf16 %v411_v4, %v407_v3  ;;  %v413_v12 = vld [vmem:[%s1201_s20 + $0xc0] sm:$0xff]  ;;  %p1263_p0 = scmp.gt.s32.totalorder %s654_s14, %s1253_s10 }
  0x47   : > { %851 = vmatpush1.bf16.msra.mxu0 %v850_v56  ;;  %v418_v7 = vld [vmem:[%s1201_s20 + $0xe8] sm:$0xff]  ;;  %v420_v11 = vld [vmem:[%s1201_s20 + $0xf8] sm:$0xff]  ;;  %v417_v13 = vld [vmem:[%s1201_s20 + $0xe0] sm:$0xff] }
  0x48   : > { %867 = vmatpush1.bf16.msra.mxu1 %v866_v60  ;;  %853 = vmatprep.subr.bf16.mxu0 %v852_v61  ;;  %v856_v10 = vpack.c.bf16 %v418_v7, %v414_v6  ;;  %v872_v14 = vpack.c.bf16 %v420_v11, %v416_v8  ;;  %v415_v15 = vld [vmem:[%s1201_s20 + $0xd0] sm:$0xff]  ;;  %v587_v17 = vld [vmem:[%s1392_s1] sm:$0xff]  ;;  %v858_v18 = vpack.c.bf16 %v417_v13, %v413_v12  ;;  %p656_p1 = pnand %p1263_p0, %p1258_p13  ;;  %v629_v53 = vld [vmem:[%s1199_s19 + $0x8] sm:$0xff] }
  0x49   : > { %869 = vmatprep.subr.bf16.mxu1 %v868_v1  ;;  %v419_v16 = vld [vmem:[%s1201_s20 + $0xf0] sm:$0xff]  ;;  %590 = vperm.xlu0 %935, %v587_v17   ;;  %v388_v20 = vld [vmem:[%s1393_s2] sm:$0xff]  ;;  %v631_v56 = vld [vmem:[%s1199_s19 + $0x18] sm:$0xff] }
  0x4a   : > { %v874_v19 = vpack.c.bf16 %v419_v16, %v415_v15  ;;  %v588_v36 = vld [vmem:[%s362_s12] sm:$0xf]  ;;  %v630_v50 = vld [vmem:[%s1199_s19 + $0x10] sm:$0xff]  ;;  %v627_v12 = vld [vmem:[%s1194_s23 + $0x18] sm:$0xff] }
  0x4b   : > { %855 = vmatpush1.bf16.msra.mxu0 %v854_v5  ;;  %v1283_v40 = vrot.slane %v588_v36, %v594_v35  ;;  %v1285_v41 = vrot.slane %v588_v36, %v602_v37  ;;  %v1289_v43 = vrot.slane %v588_v36, %v598_v38  ;;  %v1291_v44 = vrot.slane %v588_v36, %v606_v39  ;;  %v628_v47 = vld [vmem:[%s1199_s19] sm:$0xff]  ;;  %v626_v6 = vld [vmem:[%s1194_s23 + $0x10] sm:$0xff] }
  0x4c   : > { %871 = vmatpush1.bf16.msra.mxu1 %v870_v9  ;;  %857 = vmatprep.subr.bf16.mxu0 %v856_v10  ;;  %v624_v3 = vld [vmem:[%s1194_s23] sm:$0xff]  ;;  %v625_v9 = vld [vmem:[%s1194_s23 + $0x8] sm:$0xff] }
  0x4d   : > { %873 = vmatprep.subr.bf16.mxu1 %v872_v14 }
  0x4f   : > { %859 = vmatpush1.bf16.msra.mxu0 %v858_v18 }
  0x50   : > { %875 = vmatpush1.bf16.msra.mxu1 %v874_v19 }
  0x52   : > { %835 = vmatmul.mubr.msk.f32.vlgmr.msra.gmra.mrb[0].mxu0 %vm421_vm0, %v388_v20 }
  0x53   : > { %836 = vmatmul.mubr.msk.f32.vlgmr.msra.gmra.mrb[0].mxu1 %vm421_vm0, %v388_v20 }
  0xc8   : > { %v1287_v42 = vpop.permute.xlu0 %590 }
  0xc9   : > { %vm608_vm1 = vcmp.eq.s32.totalorder %v1287_v42, %v1283_v40  ;;  %vm610_vm2 = vcmp.eq.s32.totalorder %v1287_v42, %v1285_v41  ;;  %vm609_vm3 = vcmp.eq.s32.totalorder %v1287_v42, %v1289_v43  ;;  %vm611_vm4 = vcmp.eq.s32.totalorder %v1287_v42, %v1291_v44 }
 0x125   : > { %v491_v22 = vpop.f32.mrb[0].mxu0 }
 0x126   : > { %v567_v23 = vmul.f32 32.0, %v491_v22  ;;  %v562_v24 = vpop.f32.mrb[0].mxu1  ;;  %v493_v25 = vpop.f32.mrb[1].mxu0  ;;  %v661_v22 = vand.u32 (!%p656_p1), 127, %v592_v21 }
 0x127   : > { %v569_v26 = vmul.f32 32.0, %v562_v24  ;;  %v568_v27 = vmul.f32 32.0, %v493_v25  ;;  %v564_v28 = vpop.f32.mrb[1].mxu1  ;;  %v672_v24 = vstv (!%p656_p1), %s1250_s7 }
 0x128   : > { %v571_v29 = vmul.f32 1.442695, %v567_v23  ;;  %v570_v30 = vmul.f32 32.0, %v564_v28  ;;  %v665_v23 = vstv (!%p656_p1), %s1253_s10  ;;  %v673_v25 = vadd.s32 (!%p656_p1), %v672_v24, %v1272_v31 }
 0x129   : > { %v575_v32 = vmul.f32 1.442695, %v569_v26  ;;  %v573_v33 = vmul.f32 1.442695, %v568_v27  ;;  %v666_v26 = vadd.s32 (!%p656_p1), %v665_v23, %v661_v22  ;;  %v662_v27 = vadd.s32 (!%p656_p1), 128, %v661_v22 }
 0x12a   : > { %936 = vpow2.f32 %v571_v29  ;;  %v577_v34 = vmul.f32 1.442695, %v570_v30  ;;  %v663_v28 = vadd.s32 (!%p656_p1), 256, %v661_v22  ;;  %v664_v29 = vadd.s32 (!%p656_p1), 384, %v661_v22 }
 0x12b   : > { %938 = vpow2.f32 %v575_v32  ;;  %vm674_vm5 = vcmp.eq.s32.totalorder (!%p656_p1), %v666_v26, %v673_v25  ;;  %v667_v32 = vadd.s32 (!%p656_p1), %v665_v23, %v662_v27 }
 0x12c   : > { %940 = vpow2.f32 %v573_v33  ;;  %v668_v33 = vadd.s32 (!%p656_p1), %v665_v23, %v663_v28  ;;  %vm678_vm6 = vmand (!%p656_p1), %vm608_vm1, %vm674_vm5 }
 0x12d   : > { %942 = vpow2.f32 %v577_v34  ;;  %v669_v34 = vadd.s32 (!%p656_p1), %v665_v23, %v664_v29  ;;  %vm675_vm7 = vcmp.eq.s32.totalorder (!%p656_p1), %v667_v32, %v673_v25 }
 0x12e   : > { %vm676_vm8 = vcmp.eq.s32.totalorder (!%p656_p1), %v668_v33, %v673_v25  ;;  %vm679_vm10 = vmand (!%p656_p1), %vm609_vm3, %vm675_vm7 }
 0x12f   : > { %vm677_vm9 = vcmp.eq.s32.totalorder (!%p656_p1), %v669_v34, %v673_v25  ;;  %vm680_vm11 = vmand (!%p656_p1), %vm610_vm2, %vm676_vm8 }
 0x130   : > { %vm681_vm12 = vmand (!%p656_p1), %vm611_vm4, %vm677_vm9 }
 0x134   : > { %v937_v45 = vpop.eup %936 }
 0x135   : > { %v939_v46 = vpop.eup %938  ;;  %944 = vrcp.f32 %v937_v45  ;;  %v616_v48 = vmul.f32 1.2664166e-14, %v937_v45 }
 0x136   : > { %v941_v49 = vpop.eup %940  ;;  %946 = vrcp.f32 %v939_v46  ;;  %v618_v51 = vmul.f32 1.2664166e-14, %v939_v46 }
 0x137   : > { %v943_v52 = vpop.eup %942  ;;  %948 = vrcp.f32 %v941_v49  ;;  %v617_v54 = vmul.f32 1.2664166e-14, %v941_v49  ;;  %v620_v55 = vsel %vm608_vm1, 0.0, %v616_v48 }
 0x138   : > { %950 = vrcp.f32 %v943_v52  ;;  %v619_v57 = vmul.f32 1.2664166e-14, %v943_v52  ;;  %v622_v58 = vsel %vm610_vm2, 0.0, %v618_v51  ;;  %v636_v59 = vadd.f32 %v628_v47, %v620_v55 }
 0x139   : > { %v621_v60 = vsel %vm609_vm3, 0.0, %v617_v54  ;;  %v638_v61 = vadd.f32 %v630_v50, %v622_v58 }
 0x13a   : > { %v623_v62 = vsel %vm611_vm4, 0.0, %v619_v57  ;;  %v637_v63 = vadd.f32 %v629_v53, %v621_v60  ;;  %644 = vst [vmem:[%s1199_s19] sm:$0xff] %v636_v59 }
 0x13b   : > { %v639_v0 = vadd.f32 %v631_v56, %v623_v62  ;;  %646 = vst [vmem:[%s1199_s19 + $0x10] sm:$0xff] %v638_v61 }
 0x13c   : > { %645 = vst [vmem:[%s1199_s19 + $0x8] sm:$0xff] %v637_v63 }
 0x13d   : > { %647 = vst [vmem:[%s1199_s19 + $0x18] sm:$0xff] %v639_v0 }
 0x13f   : > { %v945_v1 = vpop.eup %944 }
 0x140   : > { %v947_v2 = vpop.eup %946  ;;  %v580_v4 = vmul.f32 1.2664166e-14, %v945_v1 }
 0x141   : > { %v949_v5 = vpop.eup %948  ;;  %v584_v7 = vmul.f32 1.2664166e-14, %v947_v2 }
 0x142   : > { %v951_v8 = vpop.eup %950  ;;  %v582_v10 = vmul.f32 1.2664166e-14, %v949_v5  ;;  %v612_v11 = vsel %vm608_vm1, %v580_v4, 0.0  ;;  %659 = sbr.rel (%p656_p1) target bundleno = 339 (0x153), region = 67 }
 0x143   : > { %v586_v13 = vmul.f32 1.2664166e-14, %v951_v8  ;;  %v614_v14 = vsel %vm610_vm2, %v584_v7, 0.0  ;;  %v632_v15 = vadd.f32 %v624_v3, %v612_v11  ;;  %v682_v21 = vsel (!%p656_p1), %vm678_vm6, %v612_v11, 0.0 }
 0x144   : > { %v613_v16 = vsel %vm609_vm3, %v582_v10, 0.0  ;;  %v634_v17 = vadd.f32 %v626_v6, %v614_v14  ;;  %v684_v40 = vsel (!%p656_p1), %vm680_vm11, %v614_v14, 0.0 }
 0x145   : > { %v615_v18 = vsel %vm611_vm4, %v586_v13, 0.0  ;;  %v633_v19 = vadd.f32 %v625_v9, %v613_v16  ;;  %640 = vst [vmem:[%s1194_s23] sm:$0xff] %v632_v15  ;;  %v683_v37 = vsel (!%p656_p1), %vm679_vm10, %v613_v16, 0.0 }
 0x146   : > { %v635_v20 = vadd.f32 %v627_v12, %v615_v18  ;;  %642 = vst [vmem:[%s1194_s23 + $0x10] sm:$0xff] %v634_v17  ;;  %v685_v46 = vsel (!%p656_p1), %vm681_vm12, %v615_v18, 0.0 }
 0x147   : > { %641 = vst [vmem:[%s1194_s23 + $0x8] sm:$0xff] %v633_v19 }
 0x148   : > { %643 = vst [vmem:[%s1194_s23 + $0x18] sm:$0xff] %v635_v20 }
 0x14c   : > { %v686_v30 = vld [vmem:[%s1194_s23] sm:$0xff] }
 0x14d   : > { %v690_v35 = vsub.f32 %v686_v30, %v682_v21  ;;  %v688_v36 = vld [vmem:[%s1194_s23 + $0x10] sm:$0xff] }
 0x14e   : > { %v687_v31 = vld [vmem:[%s1194_s23 + $0x8] sm:$0xff]  ;;  %v692_v45 = vsub.f32 %v688_v36, %v684_v40 }
 0x14f   : > { %v689_v38 = vld [vmem:[%s1194_s23 + $0x18] sm:$0xff]  ;;  %694 = vst [vmem:[%s1194_s23] sm:$0xff] %v690_v35  ;;  %v691_v39 = vsub.f32 %v687_v31, %v683_v37 }
 0x150   : > { %v693_v47 = vsub.f32 %v689_v38, %v685_v46  ;;  %696 = vst [vmem:[%s1194_s23 + $0x10] sm:$0xff] %v692_v45 }
 0x151   : > { %695 = vst [vmem:[%s1194_s23 + $0x8] sm:$0xff] %v691_v39 }
 0x152   : > { %697 = vst [vmem:[%s1194_s23 + $0x18] sm:$0xff] %v693_v47 }
 0x153 PF: > { %s18_s29 = sadd.s32 1, %s1006_s29   ;;  %s1400_s23 = smov %s986_s24 }
 0x154   : > { %p15_p2 = scmp.ge.s32.totalorder %s18_s29, 6   ;;  %s1401_s24 = smov %s1100_s13 }
 0x155   : > { %s1402_s25 = smov %s998_s27  ;;  %s1403_s26 = smov %s1002_s28 }
 0x156   : > { %s1404_s27 = smov %s1407_s0  ;;  %s1405_s28 = smov %s1411_s30 }
 0x157   :  { %17 = sbr.rel (!%p15_p2) target bundleno = 6 (0x6), region = 117 }

</bundles_post_ra>
